<compile_context>
chip_gen: v7x
topology: tpu7x:2x2x1
jax: 0.10.0
libtpu: 0.0.40
codegen_flags: <defaults>
</compile_context>

<pallas_src>
import functools

import numpy as np
import jax
import jax.numpy as jnp
from jax.experimental import pallas as pl
from jax.experimental.pallas import tpu as pltpu

# Cody-Waite split of 2*pi (derived from the classic cephes pi/4 constants).
# _TWO_PI_1 has 8 mantissa bits, so n * _TWO_PI_1 is exact for n up to 2^16 and
# the leading subtraction cancels exactly (Sterbenz); the remaining terms only
# contribute tiny absolute rounding error.
_TWO_PI_1 = 6.28125
_TWO_PI_2 = 1.93500518798828125e-3
_TWO_PI_3 = 3.01991598196e-7
_INV_2PI = 0.15915494309189535


def _reduced_sin(emb, phase):
    """sin(emb + phase) with emb reduced mod 2*pi so accuracy is ~1e-6 even for
    large diffusion steps (the raw TPU sin loses ~|x|*eps for |x| ~ 1e3)."""
    n = jnp.floor(emb * _INV_2PI + 0.5)          # integer-valued float
    r = emb - n * _TWO_PI_1                      # exact (Sterbenz cancellation)
    r = r - n * _TWO_PI_2
    r = r - n * _TWO_PI_3
    return jnp.sin(r + phase)


def _step_token_kernel(steps_ref, tbl_ref, out_ref, *, split):
    # steps_ref: (tb, 1) f32
    # tbl_ref:   (3, dim) f32 resident table: [freq|freq|0], [0|pi/2|0], [0|0|token]
    # out_ref:   (tb, dim) out_dtype
    steps = steps_ref[...]                       # (tb, 1)
    tb = steps.shape[0]
    dim = out_ref.shape[-1]

    if split:
        # dim % 256 == 0: both halves are 128-lane aligned -> two unmasked stores,
        # trig computed only over the sin/cos half.
        w = dim // 2
        freq = tbl_ref[0:1, :w]                  # (1, w)
        phase = tbl_ref[1:2, :w]                 # (1, w)
        token = tbl_ref[2:3, w:]                 # (1, dim - w)
        trig = _reduced_sin(steps * freq, phase)           # (tb, w)
        out_ref[:, :w] = trig.astype(out_ref.dtype)
        out_ref[:, w:] = jnp.broadcast_to(token, (tb, dim - w)).astype(out_ref.dtype)
    else:
        # Generic lane-dense path. Token lanes have freq = phase = 0, so the
        # trig stream is exactly 0 there and a plain add places the token.
        freq = tbl_ref[0:1, :]                   # (1, dim)
        phase = tbl_ref[1:2, :]
        token = tbl_ref[2:3, :]
        trig = _reduced_sin(steps * freq, phase)            # (tb, dim)
        out_ref[...] = (trig + token).astype(out_ref.dtype)


def _pick_block_b(batch, dim):
    # ~2 MiB per output tile (tiled-add measurements: ~85% of HBM roofline at
    # >= 1 MiB tiles vs ~50% at 256 KiB); cap at 4096 rows so the lane-padded
    # (tb, 1) -> (tb, 128) steps buffers stay small.  Worst-case VMEM:
    # 2*(tb*dim*4) out + 2*(tb*128*4) steps <= ~8 MiB, inside the 32 MiB
    # scoped-VMEM default on v5e/v6e and the tighter v7x budget.
    tb = (2 * 1024 * 1024) // (4 * dim)
    tb = max(8, min(4096, tb))
    tb = (tb // 8) * 8
    return batch if batch <= tb else tb


def step_token_forward(steps, token, dim, *, out_dtype=jnp.float32):
    """steps: (B,) int/float; token: (1, dim//2). Returns (B, 1, dim) out_dtype.

    out_dtype=jnp.bfloat16 halves output HBM traffic for consumers that accept
    it; all in-kernel math stays f32."""
    assert dim % 4 == 0, "StepToken requires dim % 4 == 0"
    B = steps.shape[0]
    half_dim = dim // 4
    # PyTorch original divides by (half_dim - 1) == 0 when dim == 4 -> NaN; we
    # guard with 1 (documented divergence).
    denom = max(half_dim - 1, 1)

    # Host-side constant tables (float64 math, rounded once to f32).
    freq = np.exp(
        np.arange(half_dim, dtype=np.float64) * (-np.log(10000.0) / denom)
    ).astype(np.float32)
    tok_pad = dim - 2 * half_dim                         # == dim // 2
    freq_ext = np.concatenate([freq, freq, np.zeros((tok_pad,), np.float32)])
    phase_ext = np.concatenate([
        np.zeros((half_dim,), np.float32),
        np.full((half_dim,), np.float32(np.pi / 2), np.float32),
        np.zeros((tok_pad,), np.float32),
    ])
    token_row = jnp.concatenate(
        [jnp.zeros((1, 2 * half_dim), jnp.float32),
         token.astype(jnp.float32).reshape(1, dim // 2)], axis=-1)
    tbl = jnp.concatenate(
        [jnp.asarray(freq_ext)[None, :], jnp.asarray(phase_ext)[None, :], token_row],
        axis=0)                                          # (3, dim) resident table

    steps_2d = steps.astype(jnp.float32).reshape(B, 1)

    tb = _pick_block_b(B, dim)
    grid = (pl.cdiv(B, tb),)                             # ragged last block is fine
    split = (dim % 256 == 0)

    kernel = functools.partial(_step_token_kernel, split=split)
    out = pl.pallas_call(
        kernel,
        out_shape=jax.ShapeDtypeStruct((B, dim), out_dtype),
        grid=grid,
        in_specs=[
            pl.BlockSpec((tb, 1), lambda i: (i, 0)),     # per-tile batch rows
            pl.BlockSpec((3, dim), lambda i: (0, 0)),    # resident table
        ],
        out_specs=pl.BlockSpec((tb, dim), lambda i: (i, 0)),
        compiler_params=pltpu.CompilerParams(dimension_semantics=("parallel",)),
    )(steps_2d, tbl)

    return out[:, None, :]                               # free reshape, no copy


def _reference(steps, token, dim):
    """Accurate reference: identical f32 freq table and f32 products, trig in f64."""
    half_dim = dim // 4
    denom = max(half_dim - 1, 1)
    freq = np.exp(
        np.arange(half_dim, dtype=np.float64) * (-np.log(10000.0) / denom)
    ).astype(np.float32)
    emb = (np.asarray(steps, dtype=np.float32)[:, None] * freq[None, :]).astype(np.float32)
    s = np.sin(emb.astype(np.float64)).astype(np.float32)
    c = np.cos(emb.astype(np.float64)).astype(np.float32)
    tok = np.broadcast_to(np.asarray(token, dtype=np.float32), (steps.shape[0], dim // 2))
    return np.concatenate([s, c, tok], axis=-1)[:, None, :]


def _run_case(key, B, dim):
    k_tok, k_steps = jax.random.split(key)
    token = jax.random.normal(k_tok, (1, dim // 2), dtype=jnp.float32)
    steps = jax.random.randint(k_steps, (B,), minval=0, maxval=1000, dtype=jnp.int32)
    out = jax.block_until_ready(step_token_forward(steps, token, dim))
    assert out.shape == (B, 1, dim), out.shape
    np.testing.assert_allclose(
        np.asarray(out), _reference(np.asarray(steps), np.asarray(token), dim),
        rtol=2e-5, atol=2e-5)


if __name__ == "__main__":
    root = jax.random.PRNGKey(0)
    k1, k2, k3 = jax.random.split(root, 3)

    # Small case (typical module usage; single full-array block, dim < 128).
    _run_case(k1, B=2, dim=32)

    # Larger batch, select path (dim % 256 != 0), single large block.
    _run_case(k2, B=1040, dim=128)

    # Split-store path (dim % 256 == 0) with a ragged grid (B not a multiple of tb).
    _run_case(k3, B=2500, dim=256)

    print("KERNEL_OK")
</pallas_src>

<mosaic_0001>
module attributes {stable_mosaic.version = 11 : i64} {
  func.func @_step_token_kernel(%arg0: i32, %arg1: memref<2x1xf32, #tpu.memory_space<vmem>>, %arg2: memref<3x32xf32, #tpu.memory_space<vmem>>, %arg3: memref<2x32xf32, #tpu.memory_space<vmem>>) attributes {dimension_semantics = [#tpu.dimension_semantics<parallel>], iteration_bounds = array<i64: 1>, scalar_prefetch = 0 : i64, scratch_operands = 0 : i64, tpu.core_type = #tpu.core_type<tc>, window_params = [{transform_indices = @transform_0, window_bounds = array<i64: 2, 1>}, {pipeline_mode = #tpu.pipeline_mode<synchronous>, transform_indices = @transform_1, window_bounds = array<i64: 3, 32>}, {transform_indices = @transform_2, window_bounds = array<i64: 2, 32>}]} {
    %c0 = arith.constant 0 : index
    %c0_0 = arith.constant 0 : index
    %0 = vector.load %arg1[%c0, %c0_0] : memref<2x1xf32, #tpu.memory_space<vmem>>, vector<2x1xf32>
    %c0_1 = arith.constant 0 : index
    %c0_2 = arith.constant 0 : index
    %1 = vector.load %arg2[%c0_1, %c0_2] : memref<3x32xf32, #tpu.memory_space<vmem>>, vector<1x32xf32>
    %c1 = arith.constant 1 : index
    %c0_3 = arith.constant 0 : index
    %2 = vector.load %arg2[%c1, %c0_3] : memref<3x32xf32, #tpu.memory_space<vmem>>, vector<1x32xf32>
    %c2 = arith.constant 2 : index
    %c0_4 = arith.constant 0 : index
    %3 = vector.load %arg2[%c2, %c0_4] : memref<3x32xf32, #tpu.memory_space<vmem>>, vector<1x32xf32>
    %4 = vector.broadcast %0 : vector<2x1xf32> to vector<2x32xf32>
    %5 = vector.broadcast %1 : vector<1x32xf32> to vector<2x32xf32>
    %6 = arith.mulf %4, %5 : vector<2x32xf32>
    %cst = arith.constant 0.159154937 : f32
    %7 = vector.broadcast %cst : f32 to vector<2x32xf32>
    %8 = arith.mulf %6, %7 : vector<2x32xf32>
    %cst_5 = arith.constant 5.000000e-01 : f32
    %9 = vector.broadcast %cst_5 : f32 to vector<2x32xf32>
    %10 = arith.addf %8, %9 : vector<2x32xf32>
    %11 = math.floor %10 : vector<2x32xf32>
    %cst_6 = arith.constant 6.281250e+00 : f32
    %12 = vector.broadcast %cst_6 : f32 to vector<2x32xf32>
    %13 = arith.mulf %11, %12 : vector<2x32xf32>
    %14 = arith.subf %6, %13 : vector<2x32xf32>
    %cst_7 = arith.constant 0.00193500519 : f32
    %15 = vector.broadcast %cst_7 : f32 to vector<2x32xf32>
    %16 = arith.mulf %11, %15 : vector<2x32xf32>
    %17 = arith.subf %14, %16 : vector<2x32xf32>
    %cst_8 = arith.constant 3.01991605E-7 : f32
    %18 = vector.broadcast %cst_8 : f32 to vector<2x32xf32>
    %19 = arith.mulf %11, %18 : vector<2x32xf32>
    %20 = arith.subf %17, %19 : vector<2x32xf32>
    %21 = vector.broadcast %2 : vector<1x32xf32> to vector<2x32xf32>
    %22 = arith.addf %20, %21 : vector<2x32xf32>
    %23 = math.sin %22 : vector<2x32xf32>
    %24 = vector.broadcast %3 : vector<1x32xf32> to vector<2x32xf32>
    %25 = arith.addf %23, %24 : vector<2x32xf32>
    %c0_9 = arith.constant 0 : index
    %c0_10 = arith.constant 0 : index
    %26 = vector.load %arg3[%c0_9, %c0_10] : memref<2x32xf32, #tpu.memory_space<vmem>>, vector<2x32xf32>
    tpu.vector_store %arg3[%c0_9, %c0_10], %25 {strides = array<i32>} : memref<2x32xf32, #tpu.memory_space<vmem>>, vector<2x32xf32>,
    return
  }
  func.func @transform_0(%arg0: i32) -> (i32, i32) {
    %c0_i32 = arith.constant 0 : i32
    %c0_i32_0 = arith.constant 0 : i32
    return %arg0, %c0_i32 : i32, i32
  }
  func.func @transform_1(%arg0: i32) -> (i32, i32) {
    %c0_i32 = arith.constant 0 : i32
    %c0_i32_0 = arith.constant 0 : i32
    %c0_i32_1 = arith.constant 0 : i32
    return %c0_i32, %c0_i32_0 : i32, i32
  }
  func.func @transform_2(%arg0: i32) -> (i32, i32) {
    %c0_i32 = arith.constant 0 : i32
    %c0_i32_0 = arith.constant 0 : i32
    return %arg0, %c0_i32 : i32, i32
  }
}

</mosaic_0001>

<bundles_post_ra>
// kernel: tpu_custom_call.1
= control target key start
LH: loop header
LB: loop body
LE: loop exit
PB: predicated region body
PF: predicated region fallthrough
CT: control target
= control target key end

     0   :  { %v213_v1 = vmov 0   ;;  %s281_s0 = inlined_call_operand.vmem [shape: f32[2,1], index: 0, kind: input, shape index: {}]   ;;  %s282_s1 = inlined_call_operand.vmem [shape: f32[3,32], index: 1, kind: input, shape index: {}]   ;;  %s283_s2 = inlined_call_operand.hbm [shape: f32[2,32], index: 2, kind: output, shape index: {}]  }
   0x1   :  { %v12_v0 = vld [vmem:[%s281_s0] sm:$0x3]  ;;  %184 = vset.pattern.permute.xlu0 %v213_v1 }
   0x2   :  { %7 = vsyncpa [#allocation3], 0  ;;  %18 = vperm.xlu0 %184, %v12_v0   ;;  %v165_v2 = vld [vmem:[%s282_s1] ss:$0 sm:$0xff]  ;;  %v166_v13 = vld [vmem:[%s282_s1 + $0x1] ss:$0 sm:$0xff] }
   0x3   :  { %v214_v26 = vmov 683565275   ;;  %v215_v28 = vmov 2475754826   ;;  %v216_v31 = vmov 2131351028  }
   0x4   :  { %v217_v34 = vmov 2102212464   ;;  %v218_v37 = vmov 920167782   ;;  %v219_v40 = vmov 1326507024  }
   0x5   :  { %s220_s16 = smov [#allocation2]   ;;  %vm149_vm13 = vcmask 254976  }
   0x6   :  { %s157_s17 = sshll.u32 %s220_s16, 4  ;;  %s158_s17 = int_to_ptr.vmem [resolvable:$true] %s157_s17 }
   0x7   :  { %s189_s18 = scalar_lea.vmem %s158_s17, 32  ;;  %p194_p1 = scmp.lt.s32.totalorder %s158_s17, %s158_s17 }
   0x8   :  { %p190_p0 = scmp.ne.s32.totalorder %s158_s17, %s189_s18  ;;  %p195_p2 = scmp.lt.s32.totalorder %s189_s18, %s189_s18 }
   0xa   :  { %p196_p3 = por %p195_p2, %p194_p1 }
   0xc   :  { %p197_p4 = pnand %p196_p3, %p190_p0 }
  0x81   :  { %v19_v3 = vpop.permute.xlu0 %18 }
  0x82   :  { %v25_v4 = vmul.f32 %v165_v2, %v19_v3 }
  0x84   :  { %v26_v5 = vmul.f32 0.15915494, %v25_v4 }
  0x86   :  { %v27_v6 = vadd.f32 0.5, %v26_v5 }
  0x88   :  { %v28_v7 = vfloor.f32 %v27_v6 }
  0x8a   :  { %v29_v8 = vmul.f32 6.28125, %v28_v7  ;;  %v31_v10 = vmul.f32 0.0019350052, %v28_v7  ;;  %v33_v12 = vmul.f32 3.019916e-07, %v28_v7 }
  0x8c   :  { %v30_v9 = vsub.f32 %v25_v4, %v29_v8 }
  0x8e   :  { %v32_v11 = vsub.f32 %v30_v9, %v31_v10 }
  0x90   :  { %v34_v14 = vsub.f32 %v32_v11, %v33_v12 }
  0x92   :  { %v245_v15 = vadd.f32 %v166_v13, %v34_v14 }
  0x94   :  { %v43_v16 = vand.u32 2139095040, %v245_v15  ;;  %v40_v20 = vand.u32 2147483647, %v245_v15  ;;  %vm42_vm7 = vcmp.lt.s32.totalorder %v245_v15, 0  ;;  %vm132_vm12 = vweird.f32 %v245_v15 }
  0x96   :  { %v44_v17 = vshrl.u32 %v43_v16, 23  ;;  %v47_v24 = vand.u32 8388607, %v40_v20  ;;  %vm41_vm8 = vcmp.le.f32.partialorder %v40_v20, 0.7853982 }
  0x97   :  { %v171_v20 = vld [vmem:[%s282_s1 + $0x2] ss:$0 sm:$0xff] }
  0x98   :  { %v167_v18 = vadd.s32 4294967169, %v44_v17  ;;  %v48_v42 = vor.u32 8388608, %v47_v24 }
  0x9a   :  { %v50_v19 = vadd.s32 1, %v167_v18  ;;  %v88_v56 = vshll.u32 %v48_v42, 8 }
  0x9c   :  { %vm51_vm0 = vcmp.gt.s32.totalorder %v50_v19, 0 }
  0x9d   :  { %v52_v21 = vsel %vm51_vm0, %v50_v19, 0 }
  0x9e   :  { %v54_v22 = vand.u32 31, %v52_v21  ;;  %v53_v25 = vshrl.u32 %v52_v21, 5 }
  0xa0   :  { %v55_v23 = vsub.s32 32, %v54_v22  ;;  %v57_v27 = vshll.u32 %v214_v26, %v54_v22  ;;  %v60_v29 = vshll.u32 %v215_v28, %v54_v22  ;;  %v63_v33 = vshll.u32 %v216_v31, %v54_v22 }
  0xa1   :  { %v66_v36 = vshll.u32 %v217_v34, %v54_v22  ;;  %v69_v39 = vshll.u32 %v218_v37, %v54_v22  ;;  %vm72_vm1 = vcmp.lt.s32.totalorder %v53_v25, 1  ;;  %vm75_vm2 = vcmp.lt.s32.totalorder %v53_v25, 4 }
  0xa2   :  { %v58_v30 = vshrl.u32 %v215_v28, %v55_v23  ;;  %v61_v32 = vshrl.u32 %v216_v31, %v55_v23  ;;  %v64_v35 = vshrl.u32 %v217_v34, %v55_v23  ;;  %v67_v38 = vshrl.u32 %v218_v37, %v55_v23 }
  0xa3   :  { %v70_v41 = vshrl.u32 %v219_v40, %v55_v23  ;;  %v56_v51 = vshrl.u32 %v214_v26, %v55_v23  ;;  %vm74_vm3 = vcmp.lt.s32.totalorder %v53_v25, 3  ;;  %vm73_vm4 = vcmp.lt.s32.totalorder %v53_v25, 2 }
  0xa4   :  { %v59_v43 = vor.u32 %v58_v30, %v57_v27  ;;  %v62_v44 = vor.u32 %v61_v32, %v60_v29  ;;  %v65_v45 = vor.u32 %v64_v35, %v63_v33  ;;  %v68_v46 = vor.u32 %v67_v38, %v66_v36 }
  0xa5   :  { %v71_v47 = vor.u32 %v70_v41, %v69_v39 }
  0xa6   :  { %v77_v48 = vsel %vm75_vm2, %v65_v45, 2102212464  ;;  %v80_v49 = vsel %vm72_vm1, %v59_v43, %v62_v44  ;;  %v84_v50 = vsel %vm72_vm1, %v62_v44, %v65_v45  ;;  %v81_v52 = vsel %vm75_vm2, %v68_v46, 920167782 }
  0xa7   :  { %v85_v53 = vsel %vm75_vm2, %v71_v47, 1326507024  ;;  %v82_v54 = vsel %vm74_vm3, %v65_v45, %v81_v52  ;;  %v76_v57 = vsel %vm72_vm1, %v56_v51, %v59_v43  ;;  %v78_v58 = vsel %vm74_vm3, %v62_v44, %v77_v48 }
  0xa8   :  { %v86_v55 = vsel %vm74_vm3, %v68_v46, %v85_v53  ;;  %v83_v59 = vsel %vm73_vm4, %v80_v49, %v82_v54  ;;  %v79_v1 = vsel %vm73_vm4, %v76_v57, %v78_v58 }
  0xa9   :  { %v87_v60 = vsel %vm73_vm4, %v84_v50, %v86_v55  ;;  %v254_v63 = vmul.u32.u64.low %v88_v56, %v83_v59  ;;  %v255_v0 = vmul.u32.u64.high %v88_v56, %v83_v59, %v254_v63  ;;  %v95_v3 = vmul.u32 %v88_v56, %v79_v1 }
  0xaa   :  { %v251_v61 = vmul.u32.u64.low %v88_v56, %v87_v60  ;;  %v252_v62 = vmul.u32.u64.high %v88_v56, %v87_v60, %v251_v61 }
  0xab   :  { %v98_v2 = vadd.s32 1, %v255_v0 }
  0xac   :  { %vm97_vm5 = vc.u32 %v252_v62, %v254_v63  ;;  %v96_v16 = vadd.s32 %v254_v63, %v252_v62 }
  0xad   :  { %v99_v4 = vsel %vm97_vm5, %v98_v2, %v255_v0 }
  0xae   :  { %v100_v5 = vadd.s32 %v99_v4, %v95_v3 }
  0xb0   :  { %v101_v6 = vadd.s32 536870912, %v100_v5 }
  0xb2   :  { %v102_v7 = vshrl.u32 %v101_v6, 30 }
  0xb4   :  { %v103_v8 = vshll.u32 %v102_v7, 30  ;;  %v126_v29 = vsub.s32 4, %v102_v7 }
  0xb6   :  { %v104_v9 = vsub.s32 %v100_v5, %v103_v8  ;;  %v127_v32 = vsel %vm42_vm7, %v126_v29, %v102_v7 }
  0xb7   :  { %v129_v34 = vsel %vm41_vm8, 0, %v127_v32 }
  0xb8   :  { %v106_v10 = vsub.s32 0, %v104_v9  ;;  %v133_v35 = vadd.s32 3, %v129_v34 }
  0xba   :  { %v168_v11 = vmin.u32 %v106_v10, %v104_v9  ;;  %v134_v36 = vand.u32 3, %v133_v35 }
  0xbc   :  { %v108_v12 = vclz %v168_v11  ;;  %vm139_vm9 = vcmp.eq.s32.totalorder %v134_v36, 2  ;;  %vm136_vm10 = vcmp.eq.s32.totalorder %v134_v36, 0  ;;  %vm135_vm11 = vcmp.lt.s32.totalorder %v134_v36, 2 }
  0xbe   :  { %v169_v13 = vadd.s32 4294967294, %v108_v12 }
  0xc0   :  { %vm170_vm6 = vcmp.lt.s32.totalorder %v169_v13, 0 }
  0xc1   :  { %v111_v14 = vsel %vm170_vm6, 0, %v169_v13 }
  0xc2   :  { %v112_v17 = vsub.s32 32, %v111_v14  ;;  %v116_v18 = vsub.s32 4294967266, %v111_v14  ;;  %v113_v19 = vshll.u32 %v104_v9, %v111_v14 }
  0xc4   :  { %v114_v21 = vshrl.u32 %v96_v16, %v112_v17  ;;  %v117_v22 = vadd.s32 127, %v116_v18 }
  0xc6   :  { %v115_v23 = vor.u32 %v114_v21, %v113_v19  ;;  %v118_v24 = vshll.u32 %v117_v22, 23 }
  0xc8   :  { %v119_v25 = vor.u32 4788187, %v118_v24  ;;  %v122_v27 = vcvt.s32.f32 %v115_v23 }
  0xca   :  { %v120_v26 = vand.u32 2147483647, %v119_v25 }
  0xcc   :  { %v123_v28 = vmul.f32 %v122_v27, %v120_v26 }
  0xce   :  { %v124_v30 = vxor.u32 2147483648, %v123_v28 }
  0xd0   :  { %v125_v31 = vsel %vm42_vm7, %v124_v30, %v123_v28 }
  0xd1   :  { %v128_v33 = vsel %vm41_vm8, %v245_v15, %v125_v31 }
  0xd2   :  { %185 = vcosq.f32 %v128_v33 }
  0xd3   :  { %187 = vsinq.f32 %v128_v33 }
  0xdc   :  { %v186_v37 = vpop.eup %185 }
  0xdd   :  { %v188_v38 = vpop.eup %187  ;;  %v140_v39 = vxor.u32 2147483648, %v186_v37 }
  0xde   :  { %v137_v40 = vxor.u32 2147483648, %v188_v38 }
  0xdf   :  { %v141_v41 = vsel %vm139_vm9, %v140_v39, %v188_v38 }
  0xe0   :  { %v138_v42 = vsel %vm136_vm10, %v186_v37, %v137_v40 }
  0xe1   :  { %v142_v43 = vsel %vm135_vm11, %v138_v42, %v141_v41 }
  0xe2   :  { %v143_v44 = vsel %vm132_vm12, nan, %v142_v43 }
  0xe3   :  { %v148_v45 = vadd.f32 %v171_v20, %v143_v44 }
  0xe5   :  { %150 = vst.msk [vmem:[#allocation2] sm:$0x3] %vm149_vm13, %v148_v45 }
  0xe6   :  { %200 = shalt.err (!%p197_p4)
}
  0xe7   :  { %s201_s20 = scalar_lea.hbm %s283_s2, 32 }
  0xe8   :  { %p202_p5 = scmp.ne.s32.totalorder %s283_s2, %s201_s20  ;;  %p205_p6 = scmp.lt.u32.totalorder %s201_s20, %s283_s2 }
  0xea   :  { %p207_p7 = pnand %p205_p6, %p202_p5 }
  0xec   :  { %210 = shalt.err (!%p207_p7)
}
  0xed   :  { %160 = dma.vmem_to_hbm [thread:$0]  %s158_s17, 32, %s283_s2, [#allocation3]  }
  0xee   :  { %211 = dma.done.wait [#allocation3], 32  }
  0xef   :  { %212 = vsyncadd [#allocation3], 4294967264 }
  0xf0   :  { %164 = vsyncpa [#allocation3], 1 }

</bundles_post_ra>
